<compile_context>
chip_gen: v7x
topology: tpu7x:2x2x1
jax: 0.10.0
libtpu: 0.0.40
codegen_flags: <defaults>
</compile_context>

<pallas_src>
import functools

import jax
import jax.numpy as jnp
from jax.experimental import pallas as pl
from jax.experimental.pallas import tpu as pltpu

_LANE = 128
_SUBLANE = 8


# --------------------------------------------------------------------------
# helpers
# --------------------------------------------------------------------------
def _round_up(a, m):
    return ((a + m - 1) // m) * m


def _round_down(a, m):
    return (a // m) * m


def _vmem_budget_and_limit():
    """Per-generation VMEM sizing: ~37.5% of physical for tiles, 75% cap."""
    cap = 64 << 20  # conservative fallback == v7x per-core VMEM
    try:
        info_cap = int(pltpu.get_tpu_info().vmem_capacity_bytes)
        if (32 << 20) <= info_cap <= (256 << 20):
            cap = info_cap
    except Exception:
        pass
    budget = (cap * 3) // 8      # double-buffered x + y tiles must fit here
    limit_cap = (cap * 3) // 4   # never hand the compiler the whole VMEM
    return budget, limit_cap


def _pick_feature_tile(n, d, budget_bytes, target_tile_bytes=4 << 20):
    """Lane-dense feature tile for the full-batch path."""
    dp128 = _round_up(d, _LANE)
    lanes = dp128 // _LANE
    if lanes == 1:
        # Single tile covering the full feature extent (allowed even if d<128).
        return d
    # Byte target (~4 MiB x tile) and VMEM cap (x + y, double buffered, 4 B).
    t_target = max(1, target_tile_bytes // (4 * n * _LANE))
    t_vmem = max(1, budget_bytes // (16 * n * _LANE))
    # Multi-step grid: >=2 tiles for v7x core sharding, up to 4 for pipelining.
    steps = min(lanes, 4)
    t_grid = max(1, (lanes - 1) // (steps - 1)) if steps > 1 else lanes
    t = max(1, min(t_target, t_vmem, t_grid, lanes))
    return t * _LANE


def _pick_batch_tiles(n, d, budget_bytes, target_tile_bytes=4 << 20,
                      batch_tile=None):
    """Tile sizes for the batch-tiled (large N) path."""
    dp128 = _round_up(d, _LANE)
    lanes = dp128 // _LANE
    if lanes == 1:
        td = d
    else:
        t = max(1, min(4, lanes // 2))   # keep >=2 feature tiles when possible
        td = t * _LANE
    if batch_tile is not None:
        tn = _round_up(max(1, int(batch_tile)), _SUBLANE)
    else:
        tn_target = max(_SUBLANE,
                        _round_down(target_tile_bytes // (4 * td), _SUBLANE))
        tn_vmem = max(_SUBLANE,
                      _round_down(budget_bytes // (16 * td), _SUBLANE))
        tn = min(tn_target, tn_vmem)
    tn = max(_SUBLANE, min(tn, _round_up(n, _SUBLANE)))
    return td, tn


# --------------------------------------------------------------------------
# kernels
# --------------------------------------------------------------------------
def _bnflow_fullbatch_kernel(x_ref, lg_ref, beta_ref, y_ref, ld_ref, *, eps):
    """Full batch in one block; feature axis tiled by the grid."""
    x = x_ref[...].astype(jnp.float32)            # (N, TD)
    lg = lg_ref[...]                              # (1, TD) f32
    beta = beta_ref[...]                          # (1, TD) f32

    # Two-pass batch statistics (tile is VMEM/vreg resident).
    mean = jnp.mean(x, axis=0, keepdims=True)                       # (1, TD)
    var = jnp.mean((x - mean) ** 2, axis=0, keepdims=True) + eps    # (1, TD)

    # exp / rsqrt / log use the EUP slot — effectively free while HBM-bound.
    inv_std = jax.lax.rsqrt(var)
    scale = jnp.exp(lg) * inv_std                 # (1, TD)
    shift = beta - mean * scale                   # (1, TD)

    # Folded affine: mul + add per element instead of sub + mul + mul + add.
    y_ref[...] = (x * scale + shift).astype(y_ref.dtype)
    # Per-feature logdet contribution; lane-dense, summed in the wrapper.
    ld_ref[...] = lg - 0.5 * jnp.log(var)


def _bn_stats_kernel(x_ref, mean_ref, var_ref, *, eps, n_rows, tn):
    """Pass 1 of the batch-tiled path: accumulate sum / sum-sq over batch tiles."""
    j = pl.program_id(1)

    @pl.when(j == 0)
    def _():
        mean_ref[...] = jnp.zeros_like(mean_ref)
        var_ref[...] = jnp.zeros_like(var_ref)

    x = x_ref[...].astype(jnp.float32)            # (TN, TD)
    # Mask rows beyond the real batch extent (boundary batch block).
    rows_left = n_rows - j * tn
    row_ids = jax.lax.broadcasted_iota(jnp.int32, x.shape, 0)
    xm = jnp.where(row_ids < rows_left, x, 0.0)

    mean_ref[...] += jnp.sum(xm, axis=0, keepdims=True)       # running sum
    var_ref[...] += jnp.sum(xm * xm, axis=0, keepdims=True)   # running sum-sq

    @pl.when(j == pl.num_programs(1) - 1)
    def _():
        inv_n = 1.0 / float(n_rows)
        mean = mean_ref[...] * inv_n
        var = var_ref[...] * inv_n - mean * mean + eps
        mean_ref[...] = mean
        var_ref[...] = var


def _bn_apply_kernel(x_ref, mean_ref, var_ref, lg_ref, beta_ref, y_ref):
    """Pass 2 of the batch-tiled path: apply the normalizing affine."""
    x = x_ref[...].astype(jnp.float32)            # (TN, TD)
    inv_std = jax.lax.rsqrt(var_ref[...])
    scale = jnp.exp(lg_ref[...]) * inv_std        # (1, TD)
    shift = beta_ref[...] - mean_ref[...] * scale # (1, TD)
    y_ref[...] = (x * scale + shift).astype(y_ref.dtype)


# --------------------------------------------------------------------------
# wrapper
# --------------------------------------------------------------------------
def batch_norm_flow_forward(x, log_gamma, beta, eps=1e-05, *, batch_tile=None):
    """Forward pass of BatchNormFlow (training mode, batch statistics).

    Args:
      x:          (N, D) inputs.
      log_gamma:  (D,)   parameter.
      beta:       (D,)   parameter.
      batch_tile: optional int forcing the batch-tiled (large-N) path.
    Returns:
      (y, logdet) with y of shape (N, D) and logdet of shape (1,)
      (matching PyTorch's sum(-1, keepdim=True) of a 1-D tensor).
    """
    n, d = x.shape
    budget, limit_cap = _vmem_budget_and_limit()

    lg2 = log_gamma.reshape(1, d).astype(jnp.float32)
    b2 = beta.reshape(1, d).astype(jnp.float32)

    dp128 = _round_up(d, _LANE)
    td_min_full = d if dp128 == _LANE else _LANE
    full_batch_ok = (batch_tile is None) and (16 * n * td_min_full <= budget)

    if full_batch_ok:
        # ---------------- full-batch path (N fits in a VMEM tile) ----------
        td = _pick_feature_tile(n, d, budget)
        grid = (pl.cdiv(d, td),)
        needed = 16 * n * td + 64 * td + (2 << 20)
        vmem_limit = int(min(limit_cap, max(needed, 32 << 20)))

        y, ld = pl.pallas_call(
            functools.partial(_bnflow_fullbatch_kernel, eps=eps),
            out_shape=(
                jax.ShapeDtypeStruct((n, d), x.dtype),
                jax.ShapeDtypeStruct((1, d), jnp.float32),
            ),
            grid=grid,
            in_specs=[
                pl.BlockSpec((n, td), lambda i: (0, i)),   # x tile (full batch)
                pl.BlockSpec((1, td), lambda i: (0, i)),   # log_gamma tile
                pl.BlockSpec((1, td), lambda i: (0, i)),   # beta tile
            ],
            out_specs=(
                pl.BlockSpec((n, td), lambda i: (0, i)),   # y tile
                pl.BlockSpec((1, td), lambda i: (0, i)),   # per-feature logdet
            ),
            compiler_params=pltpu.CompilerParams(
                dimension_semantics=("parallel",),
                vmem_limit_bytes=vmem_limit,
            ),
        )(x, lg2, b2)

        logdet = jnp.sum(ld[0]).reshape(1)
        return y, logdet

    # ---------------- batch-tiled path (large N) ---------------------------
    td, tn = _pick_batch_tiles(n, d, budget, batch_tile=batch_tile)
    nd = pl.cdiv(d, td)
    nn = pl.cdiv(n, tn)

    # Pass 1: per-feature mean / var (sum + sum-sq accumulated over batch tiles).
    stats_needed = 8 * tn * td + 64 * td + (2 << 20)
    vmem_limit1 = int(min(limit_cap, max(stats_needed, 32 << 20)))
    mean, var = pl.pallas_call(
        functools.partial(_bn_stats_kernel, eps=eps, n_rows=n, tn=tn),
        out_shape=(
            jax.ShapeDtypeStruct((1, d), jnp.float32),
            jax.ShapeDtypeStruct((1, d), jnp.float32),
        ),
        grid=(nd, nn),
        in_specs=[pl.BlockSpec((tn, td), lambda i, j: (j, i))],
        out_specs=(
            pl.BlockSpec((1, td), lambda i, j: (0, i)),
            pl.BlockSpec((1, td), lambda i, j: (0, i)),
        ),
        compiler_params=pltpu.CompilerParams(
            dimension_semantics=("parallel", "arbitrary"),
            vmem_limit_bytes=vmem_limit1,
        ),
    )(x)

    # Pass 2: apply the normalizing affine (fully parallel grid).
    apply_needed = 16 * tn * td + 96 * td + (2 << 20)
    vmem_limit2 = int(min(limit_cap, max(apply_needed, 32 << 20)))
    y = pl.pallas_call(
        _bn_apply_kernel,
        out_shape=jax.ShapeDtypeStruct((n, d), x.dtype),
        grid=(nd, nn),
        in_specs=[
            pl.BlockSpec((tn, td), lambda i, j: (j, i)),   # x tile
            pl.BlockSpec((1, td), lambda i, j: (0, i)),    # mean
            pl.BlockSpec((1, td), lambda i, j: (0, i)),    # var
            pl.BlockSpec((1, td), lambda i, j: (0, i)),    # log_gamma
            pl.BlockSpec((1, td), lambda i, j: (0, i)),    # beta
        ],
        out_specs=pl.BlockSpec((tn, td), lambda i, j: (j, i)),
        compiler_params=pltpu.CompilerParams(
            dimension_semantics=("parallel", "parallel"),
            vmem_limit_bytes=vmem_limit2,
        ),
    )(x, mean, var, lg2, b2)

    logdet = jnp.sum(lg2[0] - 0.5 * jnp.log(var[0])).reshape(1)
    return y, logdet


# --------------------------------------------------------------------------
# reference & test
# --------------------------------------------------------------------------
def _reference_forward(x, log_gamma, beta, eps=1e-05):
    mean = jnp.mean(x, axis=0)
    var = jnp.mean((x - mean) ** 2, axis=0) + eps
    x_hat = (x - mean) / jnp.sqrt(var)
    y = jnp.exp(log_gamma) * x_hat + beta
    logdet = jnp.sum(log_gamma - 0.5 * jnp.log(var), axis=-1, keepdims=True)
    return y, logdet


if __name__ == "__main__":
    eps = 1e-05

    # Case 1: module-default small shapes (batch=8, num_inputs=32);
    # log_gamma / beta zero-initialized as in the module's __init__.
    key = jax.random.PRNGKey(0)
    N, D = 8, 32
    x = jax.random.normal(key, (N, D), dtype=jnp.float32) * 2.0 + 0.5
    log_gamma = jnp.zeros((D,), dtype=jnp.float32)
    beta = jnp.zeros((D,), dtype=jnp.float32)

    y, logdet = batch_norm_flow_forward(x, log_gamma, beta, eps)
    jax.block_until_ready((y, logdet))
    y_ref, logdet_ref = _reference_forward(x, log_gamma, beta, eps)
    assert y.shape == (N, D) and logdet.shape == (1,)
    assert jnp.allclose(y, y_ref, atol=1e-5, rtol=1e-5)
    assert jnp.allclose(logdet, logdet_ref, atol=1e-5, rtol=1e-5)

    # Case 2: ragged feature dim (D not a multiple of 128) -> masked boundary
    # feature tile, multi-step grid, no padding / slicing in the wrapper.
    k1, k2, k3 = jax.random.split(jax.random.PRNGKey(1), 3)
    N2, D2 = 8, 200
    x2 = jax.random.normal(k1, (N2, D2), dtype=jnp.float32) * 1.5 - 0.3
    lg_2 = 0.1 * jax.random.normal(k2, (D2,), dtype=jnp.float32)
    bt_2 = 0.1 * jax.random.normal(k3, (D2,), dtype=jnp.float32)
    y2, ld2 = batch_norm_flow_forward(x2, lg_2, bt_2, eps)
    jax.block_until_ready((y2, ld2))
    y2_ref, ld2_ref = _reference_forward(x2, lg_2, bt_2, eps)
    assert jnp.allclose(y2, y2_ref, atol=1e-5, rtol=1e-5)
    assert jnp.allclose(ld2, ld2_ref, atol=1e-5, rtol=1e-5)

    # Case 3: exercise the batch-tiled (large-N) path on a small problem by
    # forcing a batch tile, including a masked boundary batch block (20 % 8 != 0).
    N3, D3 = 20, 200
    x3 = jax.random.normal(jax.random.PRNGKey(2), (N3, D3), jnp.float32) * 2.0 + 0.5
    lg_3 = 0.05 * jnp.arange(D3, dtype=jnp.float32) / D3
    bt_3 = jnp.linspace(-0.2, 0.2, D3, dtype=jnp.float32)
    y3, ld3 = batch_norm_flow_forward(x3, lg_3, bt_3, eps, batch_tile=8)
    jax.block_until_ready((y3, ld3))
    y3_ref, ld3_ref = _reference_forward(x3, lg_3, bt_3, eps)
    assert jnp.allclose(y3, y3_ref, atol=1e-4, rtol=1e-4)
    assert jnp.allclose(ld3, ld3_ref, atol=1e-4, rtol=1e-4)

    print("KERNEL_OK")
</pallas_src>

<mosaic_0001>
module attributes {stable_mosaic.version = 11 : i64} {
  func.func @_bnflow_fullbatch_kernel(%arg0: i32, %arg1: memref<8x32xf32, #tpu.memory_space<vmem>>, %arg2: memref<1x32xf32, #tpu.memory_space<vmem>>, %arg3: memref<1x32xf32, #tpu.memory_space<vmem>>, %arg4: memref<8x32xf32, #tpu.memory_space<vmem>>, %arg5: memref<1x32xf32, #tpu.memory_space<vmem>>) attributes {dimension_semantics = [#tpu.dimension_semantics<parallel>], iteration_bounds = array<i64: 1>, scalar_prefetch = 0 : i64, scratch_operands = 0 : i64, tpu.core_type = #tpu.core_type<tc>, window_params = [{transform_indices = @transform_0, window_bounds = array<i64: 8, 32>}, {transform_indices = @transform_1, window_bounds = array<i64: 1, 32>}, {transform_indices = @transform_2, window_bounds = array<i64: 1, 32>}, {transform_indices = @transform_3, window_bounds = array<i64: 8, 32>}, {transform_indices = @transform_4, window_bounds = array<i64: 1, 32>}]} {
    %c0 = arith.constant 0 : index
    %c0_0 = arith.constant 0 : index
    %0 = vector.load %arg1[%c0, %c0_0] : memref<8x32xf32, #tpu.memory_space<vmem>>, vector<8x32xf32>
    %c0_1 = arith.constant 0 : index
    %c0_2 = arith.constant 0 : index
    %1 = vector.load %arg2[%c0_1, %c0_2] : memref<1x32xf32, #tpu.memory_space<vmem>>, vector<1x32xf32>
    %c0_3 = arith.constant 0 : index
    %c0_4 = arith.constant 0 : index
    %2 = vector.load %arg3[%c0_3, %c0_4] : memref<1x32xf32, #tpu.memory_space<vmem>>, vector<1x32xf32>
    %cst = arith.constant dense<0.000000e+00> : vector<32xf32>
    %3 = vector.multi_reduction <add>, %0, %cst [0] : vector<8x32xf32> to vector<32xf32>
    %4 = vector.shape_cast %3 : vector<32xf32> to vector<1x32xf32>
    %cst_5 = arith.constant 8.000000e+00 : f32
    %5 = vector.broadcast %cst_5 : f32 to vector<1x32xf32>
    %6 = arith.divf %4, %5 : vector<1x32xf32>
    %7 = vector.broadcast %6 : vector<1x32xf32> to vector<8x32xf32>
    %8 = arith.subf %0, %7 : vector<8x32xf32>
    %9 = arith.mulf %8, %8 : vector<8x32xf32>
    %cst_6 = arith.constant dense<0.000000e+00> : vector<32xf32>
    %10 = vector.multi_reduction <add>, %9, %cst_6 [0] : vector<8x32xf32> to vector<32xf32>
    %11 = vector.shape_cast %10 : vector<32xf32> to vector<1x32xf32>
    %cst_7 = arith.constant 8.000000e+00 : f32
    %12 = vector.broadcast %cst_7 : f32 to vector<1x32xf32>
    %13 = arith.divf %11, %12 : vector<1x32xf32>
    %cst_8 = arith.constant 9.99999974E-6 : f32
    %14 = vector.broadcast %cst_8 : f32 to vector<1x32xf32>
    %15 = arith.addf %13, %14 : vector<1x32xf32>
    %16 = math.rsqrt %15 : vector<1x32xf32>
    %17 = math.exp %1 : vector<1x32xf32>
    %18 = arith.mulf %17, %16 : vector<1x32xf32>
    %19 = arith.mulf %6, %18 : vector<1x32xf32>
    %20 = arith.subf %2, %19 : vector<1x32xf32>
    %21 = vector.broadcast %18 : vector<1x32xf32> to vector<8x32xf32>
    %22 = arith.mulf %0, %21 : vector<8x32xf32>
    %23 = vector.broadcast %20 : vector<1x32xf32> to vector<8x32xf32>
    %24 = arith.addf %22, %23 : vector<8x32xf32>
    %c0_9 = arith.constant 0 : index
    %c0_10 = arith.constant 0 : index
    %25 = vector.load %arg4[%c0_9, %c0_10] : memref<8x32xf32, #tpu.memory_space<vmem>>, vector<8x32xf32>
    tpu.vector_store %arg4[%c0_9, %c0_10], %24 {strides = array<i32>} : memref<8x32xf32, #tpu.memory_space<vmem>>, vector<8x32xf32>,
    %26 = math.log %15 : vector<1x32xf32>
    %cst_11 = arith.constant 5.000000e-01 : f32
    %27 = vector.broadcast %cst_11 : f32 to vector<1x32xf32>
    %28 = arith.mulf %27, %26 : vector<1x32xf32>
    %29 = arith.subf %1, %28 : vector<1x32xf32>
    %c0_12 = arith.constant 0 : index
    %c0_13 = arith.constant 0 : index
    %30 = vector.load %arg5[%c0_12, %c0_13] : memref<1x32xf32, #tpu.memory_space<vmem>>, vector<1x32xf32>
    tpu.vector_store %arg5[%c0_12, %c0_13], %29 {strides = array<i32>} : memref<1x32xf32, #tpu.memory_space<vmem>>, vector<1x32xf32>,
    return
  }
  func.func @transform_0(%arg0: i32) -> (i32, i32) {
    %c0_i32 = arith.constant 0 : i32
    %c0_i32_0 = arith.constant 0 : i32
    return %c0_i32, %arg0 : i32, i32
  }
  func.func @transform_1(%arg0: i32) -> (i32, i32) {
    %c0_i32 = arith.constant 0 : i32
    %c0_i32_0 = arith.constant 0 : i32
    return %c0_i32, %arg0 : i32, i32
  }
  func.func @transform_2(%arg0: i32) -> (i32, i32) {
    %c0_i32 = arith.constant 0 : i32
    %c0_i32_0 = arith.constant 0 : i32
    return %c0_i32, %arg0 : i32, i32
  }
  func.func @transform_3(%arg0: i32) -> (i32, i32) {
    %c0_i32 = arith.constant 0 : i32
    %c0_i32_0 = arith.constant 0 : i32
    return %c0_i32, %arg0 : i32, i32
  }
  func.func @transform_4(%arg0: i32) -> (i32, i32) {
    %c0_i32 = arith.constant 0 : i32
    %c0_i32_0 = arith.constant 0 : i32
    return %c0_i32, %arg0 : i32, i32
  }
}

</mosaic_0001>

<bundles_post_ra>
// kernel: tpu_custom_call.1
= control target key start
LH: loop header
LB: loop body
LE: loop exit
PB: predicated region body
PF: predicated region fallthrough
CT: control target
= control target key end

     0   :  { %10 = vsyncpa [#allocation3], 0  ;;  %s271_s0 = inlined_call_operand.hbm [shape: f32[8,32], index: 0, kind: input, shape index: {}]   ;;  %s272_s1 = inlined_call_operand.vmem [shape: f32[1,32], index: 1, kind: input, shape index: {}]   ;;  %s273_s2 = inlined_call_operand.vmem [shape: f32[1,32], index: 2, kind: input, shape index: {}]   ;;  %s274_s3 = inlined_call_operand.hbm [shape: f32[8,32], index: 3, kind: output, shape index: {0}]   ;;  %s275_s4 = inlined_call_operand.hbm [shape: f32[1,32], index: 4, kind: output, shape index: {1}]  }
   0x1   :  { %11 = vsyncpa [#allocation4], 0 }
   0x2   :  { %12 = vsyncpa [#allocation7], 0  ;;  %s191_s15 = smov [#allocation2]   ;;  %s119_s19 = scalar_lea.hbm %s271_s0, 128 }
   0x3   :  { %s19_s16 = sshll.u32 %s191_s15, 4  ;;  %p120_p0 = scmp.ne.s32.totalorder %s271_s0, %s119_s19  ;;  %s20_s16 = int_to_ptr.vmem [resolvable:$true] %s19_s16 }
   0x4   :  { %p123_p1 = scmp.lt.u32.totalorder %s119_s19, %s271_s0 }
   0x6   :  { %p125_p2 = pnand %p123_p1, %p120_p0 }
   0x8   :  { %128 = shalt.err (!%p125_p2)
}
   0x9   :  { %s129_s24 = scalar_lea.vmem %s20_s16, 128  ;;  %p134_p4 = scmp.lt.s32.totalorder %s20_s16, %s20_s16 }
   0xa   :  { %p130_p3 = scmp.ne.s32.totalorder %s20_s16, %s129_s24  ;;  %p135_p5 = scmp.lt.s32.totalorder %s129_s24, %s129_s24 }
   0xc   :  { %p136_p6 = por %p135_p5, %p134_p4 }
   0xe   :  { %p137_p7 = pnand %p136_p6, %p130_p3 }
  0x10   :  { %140 = shalt.err (!%p137_p7)
}
  0x11   :  { %22 = dma.hbm_to_vmem [thread:$0]  %s271_s0, 128, %s20_s16, [#allocation3]  }
  0x12   :  { %185 = dma.done.wait [#allocation3], 128  }
  0x13   :  { %186 = vsyncadd [#allocation3], 4294967168  ;;  %vm33_vm0 = vcmask 261120   ;;  %v30_v0 = vld [vmem:[#allocation2] sm:$0xff]  ;;  %v61_v22 = vlaneseq  ;;  %vm79_vm1 = vcmask 253952   ;;  %s193_s5 = smov [#allocation5]  }
  0x14   :  { %v34_v1 = vsel %vm33_vm0, %v30_v0, 0.0  ;;  %v31_v16 = vld [vmem:[%s272_s1] sm:$0x1]  ;;  %s192_s1 = smov [#allocation6]   ;;  %s87_s6 = sshll.u32 %s193_s5, 4  ;;  %s239_s6 = int_to_ptr.vmem [resolvable:$true] %s87_s6 }
  0x15   :  { %v35_v2 = vrot.slane %v34_v1, 4  ;;  %v55_v19 = vmul.f32 1.442695, %v31_v16  ;;  %v62_v23 = vshrl.u32 %v61_v22, 7  ;;  %v32_v29 = vld [vmem:[%s273_s2] sm:$0x1] }
  0x16   :  { %s97_s30 = sshll.u32 %s192_s1, 4  ;;  %s98_s30 = int_to_ptr.vmem [resolvable:$true] %s97_s30 }
  0x17   :  { %v36_v3 = vadd.f32 %v35_v2, %v34_v1  ;;  %113 = vpow2.f32 %v55_v19  ;;  %v63_v25 = vsub.s32 0, %v62_v23  ;;  %s141_s7 = scalar_lea.vmem %s98_s30, 16  ;;  %s145_s2 = scalar_lea.vmem %s98_s30, 32 }
  0x18   :  { %p142_p8 = scmp.ne.s32.totalorder %s98_s30, %s141_s7  ;;  %p146_p9 = scmp.lt.s32.totalorder %s98_s30, %s98_s30 }
  0x19   :  { %v37_v4 = vrot.slane %v36_v3, 2  ;;  %p147_p10 = scmp.lt.s32.totalorder %s145_s2, %s141_s7 }
  0x1b   :  { %v38_v5 = vadd.f32 %v37_v4, %v36_v3  ;;  %p148_p11 = por %p147_p10, %p146_p9 }
  0x1d   :  { %v39_v6 = vrot.slane %v38_v5, 1  ;;  %p149_p12 = pnand %p148_p11, %p142_p8 }
  0x1f   :  { %v40_v7 = vadd.f32 %v39_v6, %v38_v5 }
  0x21   :  { %v42_v8 = vmul.f32 0.125, %v40_v7  ;;  %v114_v24 = vpop.eup %113 }
  0x23   :  { %v43_v9 = vsub.f32 %v30_v0, %v42_v8 }
  0x25   :  { %v44_v10 = vmul.f32 %v43_v9, %v43_v9 }
  0x27   :  { %v45_v11 = vsel %vm33_vm0, %v44_v10, 0.0 }
  0x28   :  { %v46_v12 = vrot.slane %v45_v11, 4 }
  0x2a   :  { %v47_v13 = vadd.f32 %v46_v12, %v45_v11 }
  0x2c   :  { %v48_v14 = vrot.slane %v47_v13, 2 }
  0x2e   :  { %v49_v15 = vadd.f32 %v48_v14, %v47_v13 }
  0x30   :  { %v50_v17 = vrot.slane %v49_v15, 1 }
  0x32   :  { %v51_v18 = vadd.f32 %v50_v17, %v49_v15 }
  0x34   :  { %v52_v20 = vmul.f32 0.125, %v51_v18 }
  0x36   :  { %v53_v21 = vadd.f32 1e-05, %v52_v20 }
  0x38   :  { %115 = vrsqrt.f32 %v53_v21 }
  0x39   :  { %117 = vlog2.f32 %v53_v21 }
  0x42   :  { %v116_v26 = vpop.eup %115 }
  0x43   :  { %v118_v27 = vpop.eup %117  ;;  %v57_v28 = vmul.f32 %v116_v26, %v114_v24 }
  0x44   :  { %v76_v30 = vmul.f32 0.6931472, %v118_v27 }
  0x45   :  { %v58_v31 = vmul.f32 %v57_v28, %v42_v8  ;;  %v64_v32 = vrot.slane %v57_v28, %v63_v25 }
  0x46   :  { %v77_v33 = vmul.f32 0.5, %v76_v30 }
  0x47   :  { %v59_v34 = vsub.f32 %v32_v29, %v58_v31  ;;  %v66_v35 = vmul.f32 %v64_v32, %v30_v0 }
  0x48   :  { %v78_v36 = vsub.f32 %v31_v16, %v77_v33 }
  0x49   :  { %v71_v37 = vrot.slane %v59_v34, %v63_v25 }
  0x4a   :  { %80 = vst.msk [vmem:[#allocation6] sm:$0x1] %vm79_vm1, %v78_v36 }
  0x4b   :  { %v73_v38 = vadd.f32 %v71_v37, %v66_v35 }
  0x4c   :  { %152 = shalt.err (!%p149_p12)
}
  0x4d   :  { %s153_s10 = scalar_lea.hbm %s275_s4, 16 }
  0x4e   :  { %p154_p13 = scmp.ne.s32.totalorder %s275_s4, %s153_s10  ;;  %p157_p0 = scmp.lt.u32.totalorder %s153_s10, %s275_s4 }
  0x50   :  { %p159_p1 = pnand %p157_p0, %p154_p13 }
  0x52   :  { %162 = shalt.err (!%p159_p1)
}
  0x53   :  { %100 = dma.vmem_to_hbm [thread:$0]  %s98_s30, 16, %s275_s4, [#allocation7]   ;;  %74 = vst.msk [vmem:[#allocation5] sm:$0xff] %vm33_vm0, %v73_v38 }
  0x54   :  { %s163_s17 = scalar_lea.vmem %s239_s6, 128  ;;  %p168_p3 = scmp.lt.s32.totalorder %s239_s6, %s239_s6 }
  0x55   :  { %p164_p2 = scmp.ne.s32.totalorder %s239_s6, %s163_s17  ;;  %p169_p4 = scmp.lt.s32.totalorder %s163_s17, %s163_s17 }
  0x57   :  { %p170_p5 = por %p169_p4, %p168_p3 }
  0x59   :  { %p171_p6 = pnand %p170_p5, %p164_p2 }
  0x5b   :  { %174 = shalt.err (!%p171_p6)
}
  0x5c   :  { %s175_s20 = scalar_lea.hbm %s274_s3, 128 }
  0x5d   :  { %p176_p7 = scmp.ne.s32.totalorder %s274_s3, %s175_s20  ;;  %p179_p8 = scmp.lt.u32.totalorder %s175_s20, %s274_s3 }
  0x5f   :  { %p181_p9 = pnand %p179_p8, %p176_p7 }
  0x61   :  { %184 = shalt.err (!%p181_p9)
}
  0x62   :  { %90 = dma.vmem_to_hbm [thread:$0]  %s239_s6, 128, %s274_s3, [#allocation4]  }
  0x63   :  { %187 = dma.done.wait [#allocation4], 128  }
  0x64   :  { %188 = vsyncadd [#allocation4], 4294967168 }
  0x65   :  { %189 = dma.done.wait [#allocation7], 16  }
  0x66   :  { %190 = vsyncadd [#allocation7], 4294967280 }
  0x67   :  { %107 = vsyncpa [#allocation3], 1 }
  0x68   :  { %108 = vsyncpa [#allocation4], 1 }
  0x69   :  { %109 = vsyncpa [#allocation7], 1 }

</bundles_post_ra>
